<compile_context>
chip_gen: v5e
topology: v5e:2x2
jax: 0.10.0
libtpu: 0.0.40
codegen_flags: <defaults>
</compile_context>

<pallas_src>
import jax
import jax.numpy as jnp
from jax.experimental import pallas as pl
from jax.experimental.pallas import tpu as pltpu


def _round_up(x, m):
    return ((x + m - 1) // m) * m


def _make_scale_kernel(scale):
    scale = float(scale)  # weak-typed compile-time constant; output dtype follows input

    def kernel(x_ref, o_ref):
        # Pure VPU elementwise multiply on the whole tile; kernel is DMA-bound.
        o_ref[...] = x_ref[...] * scale

    return kernel


def linear_softmax_forward(
    logits,
    targets,
    scale,
    *,
    target_block_bytes=2 << 20,  # ~2 MiB tiles -> 4 double-buffered tiles ~= 8 MiB VMEM
    min_pallas_bytes=1 << 20,    # below this, a fused XLA multiply beats a kernel launch
):
    """Pallas equivalent of Linear(num_classes, scale, margin).forward(logits, targets).

    PyTorch mutates `logits` in place (mul_); JAX is functional, so this returns a
    new array with identical values (buffer reuse is requested via io-aliasing).
    """
    del targets  # forward ignores targets (no margin applied for the plain Linear head)

    orig_shape = logits.shape
    dtype = logits.dtype
    itemsize = jnp.dtype(dtype).itemsize
    total = logits.size
    scale = float(scale)

    # Small-input fast path: launch + fusion-barrier overhead dominates the multiply.
    if total == 0 or total * itemsize < min_pallas_bytes:
        return logits * scale

    # Sublane packing: f32 -> 8 rows/vreg, bf16 -> 16, int8/fp8 -> 32.
    sublane_pack = 8 * max(1, 4 // itemsize)
    # Keep one sublane-group of a block within the block byte budget.
    max_lane_bytes = max(128 * itemsize, target_block_bytes // sublane_pack)

    # ---- choose a lane-dense 2-D view, preferring a zero-copy reshape ------------
    last = orig_shape[-1] if logits.ndim >= 1 else 0
    lane = None
    if last and last % 128 == 0 and last * itemsize <= max_lane_bytes:
        lane = last  # typical classifier heads: num_classes % 128 == 0
    else:
        for cand in (1024, 512, 256, 128):
            if total % cand == 0 and cand * itemsize <= max_lane_bytes:
                lane = cand
                break

    needs_pad = lane is None
    if needs_pad:
        # Rare fallback: pad the flattened tensor to a multiple of 128 lanes.
        lane = 128
        rows = pl.cdiv(total, lane)
        flat = jnp.pad(logits.reshape(-1), (0, rows * lane - total))
        x2d = flat.reshape(rows, lane)
    else:
        rows = total // lane
        x2d = logits.reshape(rows, lane)  # free metadata reshape, no HBM copy

    # ---- block sizing -------------------------------------------------------------
    target_rows = max(sublane_pack, target_block_bytes // (lane * itemsize))
    block_rows = max(sublane_pack, (target_rows // sublane_pack) * sublane_pack)
    # v7x megacore: ensure >=2 grid steps whenever the tensor can be split, so both
    # TensorCores stream against the shared HBM; the axis is marked "parallel".
    if rows >= 2 * sublane_pack:
        block_rows = min(block_rows, _round_up(pl.cdiv(rows, 2), sublane_pack))
    block_rows = min(block_rows, _round_up(rows, sublane_pack))
    if block_rows > rows:
        block_rows = rows  # full-extent block is always a legal block shape
    grid = (pl.cdiv(rows, block_rows),)

    n_elems = rows * lane
    out2d = pl.pallas_call(
        _make_scale_kernel(scale),
        out_shape=jax.ShapeDtypeStruct((rows, lane), dtype),
        grid=grid,
        in_specs=[pl.BlockSpec((block_rows, lane), lambda i: (i, 0))],
        out_specs=pl.BlockSpec((block_rows, lane), lambda i: (i, 0)),
        # Mirror the PyTorch in-place mul_: reuse the input buffer for the output.
        input_output_aliases={0: 0},
        cost_estimate=pl.CostEstimate(
            flops=n_elems, transcendentals=0, bytes_accessed=2 * n_elems * itemsize
        ),
        compiler_params=pltpu.CompilerParams(
            dimension_semantics=("parallel",),
        ),
    )(x2d)

    if needs_pad:
        return out2d.reshape(-1)[:total].reshape(orig_shape)
    return out2d.reshape(orig_shape)


if __name__ == "__main__":
    key = jax.random.PRNGKey(0)
    k1, k2, k3, k4 = jax.random.split(key, 4)

    scale = 16.0
    margin = 0.35  # unused by forward; kept for module-shape parity

    # Case 1: lane-aligned classifier head (zero-copy reshape path), forced through Pallas.
    logits1 = jax.random.normal(k1, (8, 128), dtype=jnp.float32)
    targets1 = jax.random.randint(k2, (8,), 0, 128, dtype=jnp.int32)
    ref1 = logits1 * scale
    out1 = jax.block_until_ready(
        linear_softmax_forward(logits1, targets1, scale, min_pallas_bytes=0)
    )
    assert out1.shape == logits1.shape and out1.dtype == logits1.dtype
    assert jnp.allclose(out1, ref1, atol=1e-6, rtol=1e-6)

    # Case 2: non-128-divisible num_classes exercises the padded fallback path.
    logits2 = jax.random.normal(k3, (7, 100), dtype=jnp.float32)
    targets2 = jax.random.randint(k4, (7,), 0, 100, dtype=jnp.int32)
    ref2 = logits2 * scale
    out2 = jax.block_until_ready(
        linear_softmax_forward(logits2, targets2, scale, min_pallas_bytes=0)
    )
    assert out2.shape == logits2.shape and out2.dtype == logits2.dtype
    assert jnp.allclose(out2, ref2, atol=1e-6, rtol=1e-6)

    # Case 3: tiny-input fast path (skips Pallas so XLA can fuse the multiply).
    out3 = jax.block_until_ready(linear_softmax_forward(logits1, targets1, scale))
    assert jnp.allclose(out3, ref1, atol=1e-6, rtol=1e-6)

    print("KERNEL_OK")
</pallas_src>

<mosaic_0001>
module attributes {stable_mosaic.version = 11 : i64} {
  func.func @kernel(%arg0: i32, %arg1: memref<8x128xf32, #tpu.memory_space<vmem>>, %arg2: memref<8x128xf32, #tpu.memory_space<vmem>>) attributes {dimension_semantics = [#tpu.dimension_semantics<parallel>], iteration_bounds = array<i64: 1>, scalar_prefetch = 0 : i64, scratch_operands = 0 : i64, tpu.core_type = #tpu.core_type<tc>, window_params = [{transform_indices = @transform_0, window_bounds = array<i64: 8, 128>}, {transform_indices = @transform_1, window_bounds = array<i64: 8, 128>}]} {
    %c0 = arith.constant 0 : index
    %c0_0 = arith.constant 0 : index
    %0 = vector.load %arg1[%c0, %c0_0] : memref<8x128xf32, #tpu.memory_space<vmem>>, vector<8x128xf32>
    %cst = arith.constant 1.600000e+01 : f32
    %1 = vector.broadcast %cst : f32 to vector<8x128xf32>
    %2 = arith.mulf %0, %1 : vector<8x128xf32>
    %c0_1 = arith.constant 0 : index
    %c0_2 = arith.constant 0 : index
    %3 = vector.load %arg2[%c0_1, %c0_2] : memref<8x128xf32, #tpu.memory_space<vmem>>, vector<8x128xf32>
    tpu.vector_store %arg2[%c0_1, %c0_2], %2 {strides = array<i32>} : memref<8x128xf32, #tpu.memory_space<vmem>>, vector<8x128xf32>,
    return
  }
  func.func @transform_0(%arg0: i32) -> (i32, i32) {
    %c0_i32 = arith.constant 0 : i32
    %c0_i32_0 = arith.constant 0 : i32
    return %arg0, %c0_i32 : i32, i32
  }
  func.func @transform_1(%arg0: i32) -> (i32, i32) {
    %c0_i32 = arith.constant 0 : i32
    %c0_i32_0 = arith.constant 0 : i32
    return %arg0, %c0_i32 : i32, i32
  }
}

</mosaic_0001>

<bundles_post_ra>
// kernel: tpu_custom_call.1
= control target key start
LH: loop header
LB: loop body
LE: loop exit
PB: predicated region body
PF: predicated region fallthrough
CT: control target
= control target key end

     0   :  { %6 = vsyncpa [#allocation3], 0  ;;  %s115_s0 = inlined_call_operand.hbm [shape: f32[8,128], index: 0, kind: input, shape index: {}, may-alias: {0,1}]   ;;  %s116_s1 = inlined_call_operand.hbm [shape: f32[8,128], index: 1, kind: output, shape index: {}, may-alias: {0,1}]  }
   0x1   :  { %7 = vsyncpa [#allocation4], 0  ;;  %s13_s8 = sshll.u32 %s115_s0, 4  ;;  %s97_s9 = smov [#allocation2]   ;;  %s14_s8 = int_to_ptr.hbm [resolvable:$true] %s13_s8 }
   0x2   :  { %s15_s10 = sshll.u32 %s97_s9, 4  ;;  %s16_s10 = int_to_ptr.vmem [resolvable:$true] %s15_s10 }
   0x3   :  { %18 = dma.hbm_to_vmem [thread:$0]  %s14_s8, 128, %s16_s10, [#allocation3]  }
   0x4   :  { %93 = dma.done.wait [#allocation3], 128  }
   0x5   :  { %94 = vsyncadd [#allocation3], 4294967168  ;;  %s98_s11 = smov [#allocation5]   ;;  %s33_s15 = sshll.u32 %s116_s1, 4  ;;  %v23_v0 = vld [vmem:[#allocation2] sm:$0xff]  ;;  %s34_s15 = int_to_ptr.hbm [resolvable:$true] %s33_s15 }
   0x6   :  { %s31_s12 = sshll.u32 %s98_s11, 4  ;;  %v24_v1 = vmul.f32 16.0, %v23_v0  ;;  %s32_s12 = int_to_ptr.vmem [resolvable:$true] %s31_s12 }
   0x8   :  { %25 = vst [vmem:[#allocation5] sm:$0xff] %v24_v1 }
   0x9   :  { %36 = dma.vmem_to_hbm [thread:$0]  %s32_s12, 128, %s34_s15, [#allocation4]  }
   0xa   :  { %95 = dma.done.wait [#allocation4], 128  }
   0xb   :  { %96 = vsyncadd [#allocation4], 4294967168 }
   0xc   :  { %41 = vsyncpa [#allocation3], 1 }
   0xd   :  { %42 = vsyncpa [#allocation4], 1 }

</bundles_post_ra>
